<compile_context>
chip_gen: v7x
topology: tpu7x:2x2x1
jax: 0.10.0
libtpu: 0.0.40
codegen_flags: <defaults>
</compile_context>

<pallas_src>
import jax
import jax.numpy as jnp
from jax.experimental import pallas as pl
from jax.experimental.pallas import tpu as pltpu


def _attention_kernel(x_ref, w1_ref, b1_ref, w2_ref, b2_ref, o_ref):
    # x_ref : (C, TILE_S)   channels on sublanes, spatial on lanes (lane-dense)
    # w1_ref: (Cr, C)       b1_ref: (Cr, 1)
    # w2_ref: (C, Cr)       b2_ref: (C, 1)
    # o_ref : (C, TILE_S)
    x = x_ref[...].astype(jnp.float32)

    # Conv2d(C -> C//8, kernel_size=1) per pixel == W1 @ x_cols + b1
    h = jnp.dot(w1_ref[...], x, preferred_element_type=jnp.float32) + b1_ref[...]
    # ReLU
    h = jnp.maximum(h, 0.0)
    # Conv2d(C//8 -> C, kernel_size=1) per pixel == W2 @ h + b2
    a = jnp.dot(w2_ref[...], h, preferred_element_type=jnp.float32) + b2_ref[...]
    # Sigmoid (EUP path)
    a = jax.nn.sigmoid(a)

    # Elementwise gating: x * attention_weights
    o_ref[...] = (x * a).astype(o_ref.dtype)


def attention_block(x_nchw, w1, b1, w2, b2, *, tile_s=1024):
    """x_nchw: (N, C, H, W); w1: (C//8, C); b1: (C//8,); w2: (C, C//8); b2: (C,)."""
    N, C, H, W = x_nchw.shape
    Cr = w1.shape[0]  # C // 8
    S = H * W

    # Channels-first slab; reshape only (no HBM transpose round-trips).
    x3 = x_nchw.reshape(N, C, S)

    # Lane-friendly spatial tile: either the full spatial extent or a multiple of 128.
    if tile_s >= S:
        tile_s = S
    else:
        tile_s = max(128, (tile_s // 128) * 128)
        if tile_s >= S:
            tile_s = S

    # Ragged last spatial block is tolerated: the op is column-local, and Pallas
    # masks out-of-bounds writes, so no padding / slicing copies are needed.
    grid = (N, pl.cdiv(S, tile_s))

    b1_2d = b1.reshape(Cr, 1)
    b2_2d = b2.reshape(C, 1)

    # VMEM budget: double-buffered in+out tiles plus (tiny) weights, with headroom.
    # Stays well under the v7x 64 MiB physical limit; v5e/v6e have plenty.
    elt = jnp.dtype(x_nchw.dtype).itemsize
    tile_bytes = C * tile_s * elt
    vmem_need = 4 * tile_bytes + 8 * (Cr * C + Cr + C) * 4 + (2 << 20)
    vmem_limit = int(min(max(vmem_need, 32 << 20), 64 << 20))

    out = pl.pallas_call(
        _attention_kernel,
        out_shape=jax.ShapeDtypeStruct((N, C, S), x_nchw.dtype),
        grid_spec=pltpu.PrefetchScalarGridSpec(
            num_scalar_prefetch=0,
            grid=grid,
            in_specs=[
                pl.BlockSpec((None, C, tile_s), lambda n, s: (n, 0, s)),  # x tile
                pl.BlockSpec((Cr, C), lambda n, s: (0, 0)),               # W1 (full)
                pl.BlockSpec((Cr, 1), lambda n, s: (0, 0)),               # b1
                pl.BlockSpec((C, Cr), lambda n, s: (0, 0)),               # W2 (full)
                pl.BlockSpec((C, 1), lambda n, s: (0, 0)),                # b2
            ],
            out_specs=pl.BlockSpec((None, C, tile_s), lambda n, s: (n, 0, s)),
        ),
        compiler_params=pltpu.CompilerParams(
            dimension_semantics=("parallel", "parallel"),
            vmem_limit_bytes=vmem_limit,
        ),
    )(x3, w1, b1_2d, w2, b2_2d)

    # (N, C, S) -> (N, C, H, W): pure reshape, no transpose.
    return out.reshape(N, C, H, W)


def _reference(x_nchw, w1, b1, w2, b2):
    # Pure-JAX reference of the PyTorch forward (1x1 convs as einsums).
    h = jnp.einsum("nchw,oc->nohw", x_nchw, w1) + b1[None, :, None, None]
    h = jnp.maximum(h, 0.0)
    a = jnp.einsum("nchw,oc->nohw", h, w2) + b2[None, :, None, None]
    a = jax.nn.sigmoid(a)
    return x_nchw * a


if __name__ == "__main__":
    # Small shapes consistent with the module: in_channels must be >= 8 (C // 8 >= 1).
    N, C, H, W = 2, 16, 16, 16
    Cr = C // 8

    key = jax.random.PRNGKey(0)
    k_x, k_w1, k_b1, k_w2, k_b2 = jax.random.split(key, 5)

    x = jax.random.normal(k_x, (N, C, H, W), dtype=jnp.float32)
    # Deterministic synthetic parameters (shapes match nn.Conv2d with 1x1 kernels).
    w1 = jax.random.normal(k_w1, (Cr, C), dtype=jnp.float32) * 0.2   # Conv2d(C, C//8, 1).weight squeezed
    b1 = jax.random.normal(k_b1, (Cr,), dtype=jnp.float32) * 0.1
    w2 = jax.random.normal(k_w2, (C, Cr), dtype=jnp.float32) * 0.2   # Conv2d(C//8, C, 1).weight squeezed
    b2 = jax.random.normal(k_b2, (C,), dtype=jnp.float32) * 0.1

    out = attention_block(x, w1, b1, w2, b2)
    out = jax.block_until_ready(out)

    ref = _reference(x, w1, b1, w2, b2)
    assert out.shape == (N, C, H, W)
    assert jnp.allclose(out, ref, atol=1e-5, rtol=1e-5), "mismatch vs reference"

    print("KERNEL_OK")
</pallas_src>

<mosaic_0001>
module attributes {stable_mosaic.version = 11 : i64} {
  func.func @_attention_kernel(%arg0: i32, %arg1: i32, %arg2: memref<1x16x256xf32, #tpu.memory_space<vmem>>, %arg3: memref<2x16xf32, #tpu.memory_space<vmem>>, %arg4: memref<2x1xf32, #tpu.memory_space<vmem>>, %arg5: memref<16x2xf32, #tpu.memory_space<vmem>>, %arg6: memref<16x1xf32, #tpu.memory_space<vmem>>, %arg7: memref<1x16x256xf32, #tpu.memory_space<vmem>>) attributes {dimension_semantics = [#tpu.dimension_semantics<parallel>, #tpu.dimension_semantics<parallel>], iteration_bounds = array<i64: 2, 1>, scalar_prefetch = 0 : i64, scratch_operands = 0 : i64, tpu.core_type = #tpu.core_type<tc>, window_params = [{transform_indices = @transform_0, window_bounds = array<i64: 1, 16, 256>}, {pipeline_mode = #tpu.pipeline_mode<synchronous>, transform_indices = @transform_1, window_bounds = array<i64: 2, 16>}, {pipeline_mode = #tpu.pipeline_mode<synchronous>, transform_indices = @transform_2, window_bounds = array<i64: 2, 1>}, {pipeline_mode = #tpu.pipeline_mode<synchronous>, transform_indices = @transform_3, window_bounds = array<i64: 16, 2>}, {pipeline_mode = #tpu.pipeline_mode<synchronous>, transform_indices = @transform_4, window_bounds = array<i64: 16, 1>}, {transform_indices = @transform_5, window_bounds = array<i64: 1, 16, 256>}]} {
    %c0 = arith.constant 0 : index
    %c0_0 = arith.constant 0 : index
    %c0_1 = arith.constant 0 : index
    %0 = vector.load %arg2[%c0, %c0_0, %c0_1] : memref<1x16x256xf32, #tpu.memory_space<vmem>>, vector<1x16x256xf32>
    %1 = vector.shape_cast %0 : vector<1x16x256xf32> to vector<16x256xf32>
    %c0_2 = arith.constant 0 : index
    %c0_3 = arith.constant 0 : index
    %2 = vector.load %arg3[%c0_2, %c0_3] : memref<2x16xf32, #tpu.memory_space<vmem>>, vector<2x16xf32>
    %cst = arith.constant dense<0.000000e+00> : vector<2x256xf32>
    %3 = tpu.matmul %2, %1, %cst {dimension_numbers = #tpu.dot_dimension_numbers<[1], [0], [0], [1], [0, 0, 1, 1], [], []>} : vector<2x16xf32>, vector<16x256xf32>, vector<2x256xf32> -> vector<2x256xf32>
    %c0_4 = arith.constant 0 : index
    %c0_5 = arith.constant 0 : index
    %4 = vector.load %arg4[%c0_4, %c0_5] : memref<2x1xf32, #tpu.memory_space<vmem>>, vector<2x1xf32>
    %5 = vector.broadcast %4 : vector<2x1xf32> to vector<2x256xf32>
    %6 = arith.addf %3, %5 : vector<2x256xf32>
    %cst_6 = arith.constant 0.000000e+00 : f32
    %7 = vector.broadcast %cst_6 : f32 to vector<2x256xf32>
    %8 = arith.maximumf %6, %7 : vector<2x256xf32>
    %c0_7 = arith.constant 0 : index
    %c0_8 = arith.constant 0 : index
    %9 = vector.load %arg5[%c0_7, %c0_8] : memref<16x2xf32, #tpu.memory_space<vmem>>, vector<16x2xf32>
    %cst_9 = arith.constant dense<0.000000e+00> : vector<16x256xf32>
    %10 = tpu.matmul %9, %8, %cst_9 {dimension_numbers = #tpu.dot_dimension_numbers<[1], [0], [0], [1], [0, 0, 1, 1], [], []>} : vector<16x2xf32>, vector<2x256xf32>, vector<16x256xf32> -> vector<16x256xf32>
    %c0_10 = arith.constant 0 : index
    %c0_11 = arith.constant 0 : index
    %11 = vector.load %arg6[%c0_10, %c0_11] : memref<16x1xf32, #tpu.memory_space<vmem>>, vector<16x1xf32>
    %12 = vector.broadcast %11 : vector<16x1xf32> to vector<16x256xf32>
    %13 = arith.addf %10, %12 : vector<16x256xf32>
    %14 = arith.negf %13 : vector<16x256xf32>
    %15 = math.exp %14 : vector<16x256xf32>
    %cst_12 = arith.constant 1.000000e+00 : f32
    %16 = vector.broadcast %cst_12 : f32 to vector<16x256xf32>
    %17 = arith.addf %16, %15 : vector<16x256xf32>
    %18 = arith.divf %16, %17 : vector<16x256xf32>
    %19 = arith.mulf %1, %18 : vector<16x256xf32>
    %c0_13 = arith.constant 0 : index
    %c0_14 = arith.constant 0 : index
    %c0_15 = arith.constant 0 : index
    %20 = vector.load %arg7[%c0_13, %c0_14, %c0_15] : memref<1x16x256xf32, #tpu.memory_space<vmem>>, vector<1x16x256xf32>
    %21 = vector.shape_cast %20 : vector<1x16x256xf32> to vector<16x256xf32>
    %22 = vector.shape_cast %19 : vector<16x256xf32> to vector<1x16x256xf32>
    tpu.vector_store %arg7[%c0_13, %c0_14, %c0_15], %22 {strides = array<i32>} : memref<1x16x256xf32, #tpu.memory_space<vmem>>, vector<1x16x256xf32>,
    return
  }
  func.func @transform_0(%arg0: i32, %arg1: i32) -> (i32, i32, i32) {
    %c0_i32 = arith.constant 0 : i32
    %c0_i32_0 = arith.constant 0 : i32
    return %arg0, %c0_i32, %arg1 : i32, i32, i32
  }
  func.func @transform_1(%arg0: i32, %arg1: i32) -> (i32, i32) {
    %c0_i32 = arith.constant 0 : i32
    %c0_i32_0 = arith.constant 0 : i32
    %c0_i32_1 = arith.constant 0 : i32
    return %c0_i32, %c0_i32_0 : i32, i32
  }
  func.func @transform_2(%arg0: i32, %arg1: i32) -> (i32, i32) {
    %c0_i32 = arith.constant 0 : i32
    %c0_i32_0 = arith.constant 0 : i32
    %c0_i32_1 = arith.constant 0 : i32
    return %c0_i32, %c0_i32_0 : i32, i32
  }
  func.func @transform_3(%arg0: i32, %arg1: i32) -> (i32, i32) {
    %c0_i32 = arith.constant 0 : i32
    %c0_i32_0 = arith.constant 0 : i32
    %c0_i32_1 = arith.constant 0 : i32
    return %c0_i32, %c0_i32_0 : i32, i32
  }
  func.func @transform_4(%arg0: i32, %arg1: i32) -> (i32, i32) {
    %c0_i32 = arith.constant 0 : i32
    %c0_i32_0 = arith.constant 0 : i32
    %c0_i32_1 = arith.constant 0 : i32
    return %c0_i32, %c0_i32_0 : i32, i32
  }
  func.func @transform_5(%arg0: i32, %arg1: i32) -> (i32, i32, i32) {
    %c0_i32 = arith.constant 0 : i32
    %c0_i32_0 = arith.constant 0 : i32
    return %arg0, %c0_i32, %arg1 : i32, i32, i32
  }
}

</mosaic_0001>

<bundles_post_ra>
// kernel: tpu_custom_call.1
= control target key start
LH: loop header
LB: loop body
LE: loop exit
PB: predicated region body
PF: predicated region fallthrough
CT: control target
= control target key end

     0   :  { %10 = vsyncpa [#allocation3], 0  ;;  %s1072_s0 = inlined_call_operand.hbm [shape: f32[2,16,256], index: 0, kind: input, shape index: {}]   ;;  %s1073_s1 = inlined_call_operand.vmem [shape: f32[2,16], index: 1, kind: input, shape index: {}]   ;;  %s1074_s2 = inlined_call_operand.vmem [shape: f32[2,1], index: 2, kind: input, shape index: {}]   ;;  %s1075_s3 = inlined_call_operand.vmem [shape: f32[16,2], index: 3, kind: input, shape index: {}]   ;;  %s1076_s4 = inlined_call_operand.vmem [shape: f32[16,1], index: 4, kind: input, shape index: {}]   ;;  %s1077_s5 = inlined_call_operand.hbm [shape: f32[2,16,256], index: 5, kind: output, shape index: {}]  }
   0x1   :  { %12 = vsyncpa [#allocation3 + $0x1], 0 }
   0x2   :  { %13 = vsyncpa [#allocation4], 0 }
   0x3   :  { %15 = vsyncpa [#allocation4 + $0x1], 0  ;;  %s859_s18 = smov 0   ;;  %s861_s19 = smov 0  }
   0x4   :  { %s863_s20 = smov 0   ;;  %s865_s21 = smov 0  }
   0x5   :  { %s867_s22 = smov 0   ;;  %s869_s23 = smov 0  }
   0x6 LB: > { %s591_s24 = sadd.s32 4294967295, %s819_s23   ;;  %s592_s25 = sadd.s32 4294967294, %s819_s23   ;;  %s819_s23 = sphi %s869_s23, %s21_s23   ;;  %s815_s22 = sphi %s867_s22, %s1092_s22   ;;  %s811_s21 = sphi %s865_s21, %s1091_s21   ;;  %s807_s20 = sphi %s863_s20, %s1090_s20   ;;  %s803_s19 = sphi %s861_s19, %s1089_s19   ;;  %s799_s18 = sphi %s859_s18, %s1088_s18  }
   0x7   : > { %s33_s26 = sadd.s32 1, %s815_s22  ;;  %s42_s27 = sadd.s32 1, %s807_s20 }
   0x8   : > { %p35_p0 = scmp.ge.s32.totalorder %s33_s26, 2  ;;  %p49_p1 = scmp.ne.s32.totalorder %s807_s20, %s803_s19 }
   0x9   : > { %p50_p2 = scmp.eq.s32.totalorder %s819_s23, 0  ;;  %p55_p3 = scmp.ne.s32.totalorder %s803_s19, %s799_s18 }
   0xa   : > { %s1094_s26 = smov (%p35_p0, %s33_s26), 0  ;;  %p56_p5 = scmp.eq.s32.totalorder %s591_s24, 0 }
   0xb   : > { %p900_p4 = por %p50_p2, %p49_p1  ;;  %s37_s29 = ssub.s32 %s815_s22, %s1094_s26 }
   0xc   : > { %p165_p6 = scmp.eq.s32.totalorder %s591_s24, 1  ;;  %p40_p7 = scmp.eq.s32.totalorder %s37_s29, 0 }
   0xd   : > { %p906_p8 = por %p56_p5, %p55_p3  ;;  %p171_p10 = scmp.eq.s32.totalorder %s592_s25, 1 }
   0xe   : > { %p910_p9 = por %p165_p6, %p49_p1  ;;  %p633_p13 = scmp.lt.s32.totalorder %s819_s23, 2 }
   0xf   : > { %s915_s7 = scalar_select %p40_p7, %s807_s20, %s42_s27  }
  0x10   : > { %s1081_s6 = scalar_select %p910_p9, 1, 0 }
  0x11   : > { %p917_p11 = por %p171_p10, %p55_p3  ;;  %s203_s9 = sand.u32 1, %s807_s20  }
  0x12   : > { %s595_s10 = sshll.u32 %s203_s9, 5  ;;  %s615_s11 = sshll.u32 %s815_s22, 9 }
  0x13   : > { %s1082_s8 = scalar_select %p917_p11, 1, 0 }
  0x14   : > { %s928_s14 = scalar_lea.hbm %s1072_s0, %s615_s11  ;;  %s207_s15 = scalar_lea.vmem [#allocation2], %s595_s10 }
  0x15   : > { %s216_s16 = sshll.u32 %s207_s15, 4  ;;  %p934_p0 = pnand %p633_p13, %p900_p4  ;;  %s930_s16 = int_to_ptr.vmem [resolvable:$true] %s216_s16 }
  0x16   : > { %s939_s24 = scalar_lea.sflag [#allocation3], %s203_s9  ;;  %s707_s25 = scalar_lea.hbm %s928_s14, 512 }
  0x17   : > { %p708_p2 = scmp.ne.s32.totalorder %s928_s14, %s707_s25  ;;  %p709_p3 = pneg %p934_p0 }
  0x18   : > { %s712_s28 = scalar_lea.hbm %s1072_s0, 1024  ;;  %p713_p4 = scmp.lt.u32.totalorder %s928_s14, %s1072_s0 }
  0x19   : > { %p710_p5 = pnand %p709_p3, %p708_p2  ;;  %p714_p7 = scmp.lt.u32.totalorder %s712_s28, %s707_s25 }
  0x1a   : > { %p716_p13 = scmp.lt.u32.totalorder %s707_s25, %s928_s14 }
  0x1b   : > { %p711_p6 = pneg %p710_p5  ;;  %p715_p10 = por %p714_p7, %p713_p4 }
  0x1d   : > { %p717_p12 = por %p716_p13, %p715_p10 }
  0x1f   : > { %p718_p1 = pnand %p717_p12, %p711_p6 }
  0x21   : > { %721 = shalt.err (!%p718_p1)
}
  0x22   : > { %s722_s9 = scalar_lea.vmem %s930_s16, 512  ;;  %s821_s12 = smov [#allocation2]  }
  0x23   : > { %p723_p2 = scmp.ne.s32.totalorder %s930_s16, %s722_s9  ;;  %s727_s13 = sshll.u32 %s821_s12, 4  ;;  %s728_s13 = int_to_ptr.vmem [resolvable:$false] %s727_s13 }
  0x24   : > { %s729_s15 = scalar_lea.vmem %s728_s13, 1024  ;;  %p730_p9 = scmp.lt.s32.totalorder %s930_s16, %s728_s13 }
  0x25   : > { %p725_p5 = pnand %p723_p2, %p709_p3  ;;  %p731_p4 = scmp.lt.s32.totalorder %s729_s15, %s722_s9 }
  0x27   : > { %p726_p11 = pneg %p725_p5  ;;  %p732_p7 = por %p731_p4, %p730_p9 }
  0x29   : > { %p733_p10 = pnand %p732_p7, %p726_p11 }
  0x2b   : > { %736 = shalt.err (!%p733_p10)
}
  0x2c   : > { %s822_s25 = smov 256   ;;  %s823_s27 = smov 16  }
  0x2d   : > { %628 = dma.hbm_to_vmem [thread:$0]  (!%p934_p0), %s928_s14, 512, %s930_s16, %s939_s24, %s822_s25, %s822_s25, %s823_s27  }
  0x2e   : > { %p224_p12 = scmp.lt.s32.totalorder %s819_s23, 3  ;;  %p1084_p1 = scmp.ge.s32.totalorder %s819_s23, 1 }
  0x30   : > { %p225_p3 = pnand %p1084_p1, %p224_p12 }
  0x31   : > { %s971_s29 = sand.u32 (!%p225_p3), 1, %s803_s19  }
  0x32   : > { %228 = sbr.rel (%p225_p3) target bundleno = 546 (0x222), region = 40  ;;  %s599_s28 = sshll.u32 (!%p225_p3), %s971_s29, 5 }
  0x33   : > { %s231_s10 = scalar_lea.sflag (!%p225_p3), [#allocation3], %s971_s29  ;;  %s234_s11 = scalar_lea.vmem (!%p225_p3), [#allocation2], %s599_s28 }
  0x39   : > { %790 = dma.done.wait (%p906_p8), %s231_s10, 512  }
  0x3a   : > { %792 = vsyncadd (%p906_p8), %s231_s10, 4294966784  ;;  %v824_v0 = vmov 0.0   ;;  %v825_v1 = vmov 0   ;;  %v981_v2 = vld [vmem:[%s234_s11 + $0x8] sm:$0xff]  ;;  %v983_v3 = vld [vmem:[%s234_s11 + $0x18] sm:$0xff]  ;;  %vm274_vm0 = vcmask 130048  }
  0x3b   : > { %342 = vmatprep.mubr.f32.mxu0 %v824_v0  ;;  %689 = vset.pattern.permute.xlu0 %v825_v1  ;;  %v985_v4 = vld [vmem:[%s234_s11] sm:$0xff]  ;;  %v617_v5 = vpack.c.bf16 %v983_v3, %v981_v2  ;;  %v989_v6 = vld [vmem:[%s234_s11 + $0x10] sm:$0xff]  ;;  %v354_v11 = vld [vmem:[%s1076_s4 + $0x8] sm:$0xff]  ;;  %vm372_vm1 = vcmask 1041408   ;;  %vm365_vm2 = vcmask 15360   ;;  %s616_s11 = sshll.u32 %s811_s21, 9 }
  0x3c   : > { %443 = vmatprep.mubr.f32.mxu1 %v824_v0  ;;  %690 = vset.pattern.permute.xlu1 %v825_v1  ;;  %v268_v7 = vld [vmem:[%s1074_s2] sm:$0x3]  ;;  %v619_v8 = vpack.c.bf16 %v989_v6, %v985_v4  ;;  %v352_v20 = vld [vmem:[%s1075_s3 + $0x8] sm:$0xff]  ;;  %s260_s14 = scalar_lea.vmem [#allocation5], %s599_s28  ;;  %s1020_s24 = scalar_lea.hbm %s1077_s5, %s616_s11 }
  0x3d   : > { %271 = vperm.xlu0 %689, %v268_v7   ;;  %618 = vmatprep.subr.bf16.mxu0 %v617_v5  ;;  %v353_v9 = vld [vmem:[%s1076_s4] sm:$0xff]  ;;  %s504_s30 = sshll.u32 %s260_s14, 4  ;;  %s489_s21 = scalar_lea.sflag [#allocation4], %s971_s29  ;;  %s1022_s30 = int_to_ptr.vmem [resolvable:$true] %s504_s30 }
  0x3e   : > { %620 = vmatpush1.bf16.msra.mxu0 %v619_v8  ;;  %v267_v10 = vld [vmem:[%s1073_s1] sm:$0x3]  ;;  %362 = vperm.xlu1 %690, %v354_v11   ;;  %s737_s28 = scalar_lea.vmem %s1022_s30, 512  ;;  %p1085_p9 = scmp.ne.s32.totalorder %s1081_s6, 0 }
  0x3f   : > { %v351_v19 = vld [vmem:[%s1075_s3] sm:$0xff]  ;;  %p738_p8 = scmp.ne.s32.totalorder %s1022_s30, %s737_s28  ;;  %s826_s9 = smov [#allocation5]  }
  0x40   : > { %s741_s12 = sshll.u32 %s826_s9, 4  ;;  %s742_s12 = int_to_ptr.vmem [resolvable:$false] %s741_s12 }
  0x41   : > { %357 = vperm.xlu0 %689, %v353_v9   ;;  %601 = vmatmul.mubr.msk.f32.vlgmr.msra.gmra.mrb[0].mxu0 %vm274_vm0, %v267_v10  ;;  %p739_p11 = pnand %p738_p8, %p1085_p9  ;;  %s743_s13 = scalar_lea.vmem %s742_s12, 1024 }
  0x42   : > { %p744_p6 = scmp.lt.s32.totalorder %s1022_s30, %s742_s12  ;;  %p745_p13 = scmp.lt.s32.totalorder %s743_s13, %s737_s28 }
  0x43   : > { %p740_p0 = pneg %p739_p11 }
  0x44   : > { %p746_p2 = por %p745_p13, %p744_p6 }
  0x46   : > { %p747_p5 = pnand %p746_p2, %p740_p0 }
  0xbc   : > { %v272_v12 = vpop.permute.xlu0 %271 }
  0xbd   : > { %v363_v26 = vpop.permute.xlu1 %362 }
  0xc0   : > { %v358_v21 = vpop.permute.xlu0 %357 }
 0x114   : > { %v344_v13 = vpop.f32.mrb[0].mxu0 }
 0x115   : > { %v345_v14 = vadd.f32 %v344_v13, %v272_v12  ;;  %v346_v15 = vpop.f32.mrb[1].mxu0 }
 0x116   : > { %v347_v16 = vadd.f32 %v346_v15, %v272_v12 }
 0x117   : > { %v349_v18 = vmax.f32 %v345_v14, 0.0 }
 0x118   : > { %v350_v17 = vmax.f32 %v347_v16, 0.0 }
 0x11a   : > { %602 = vmatprep.subr.msk.mxu1 %vm372_vm1, %v350_v17 }
 0x11b   : > { %603 = vmatpush1.msk.msra.mxu1 %vm372_vm1, %v349_v18 }
 0x11c   : > { %604 = vmatmul.mubr.msk.f32.vlgmr.msra.gmra.mrb[0].mxu1 %vm365_vm2, %v351_v19 }
 0x11d   : > { %449 = vmatprep.mubr.f32.mxu1 %v824_v0 }
 0x120   : > { %605 = vmatmul.mubr.msk.f32.gmra.mrb[2].mxu1 %vm365_vm2, %v352_v20 }
 0x1ef   : > { %v445_v22 = vpop.f32.mrb[0].mxu1 }
 0x1f0   : > { %v446_v23 = vadd.f32 %v445_v22, %v358_v21  ;;  %v447_v24 = vpop.f32.mrb[1].mxu1 }
 0x1f1   : > { %v448_v25 = vadd.f32 %v447_v24, %v358_v21 }
 0x1f2   : > { %v606_v27 = vmul.f32 -1.442695, %v446_v23 }
 0x1f3   : > { %v607_v28 = vmul.f32 -1.442695, %v448_v25  ;;  %v451_v29 = vpop.f32.mrb[2].mxu1 }
 0x1f4   : > { %691 = vpow2.f32 %v606_v27  ;;  %v452_v30 = vadd.f32 %v451_v29, %v363_v26  ;;  %v453_v31 = vpop.f32.mrb[3].mxu1 }
 0x1f5   : > { %693 = vpow2.f32 %v607_v28  ;;  %v454_v32 = vadd.f32 %v453_v31, %v363_v26 }
 0x1f6   : > { %v608_v33 = vmul.f32 -1.442695, %v452_v30 }
 0x1f7   : > { %v609_v34 = vmul.f32 -1.442695, %v454_v32 }
 0x1f8   : > { %695 = vpow2.f32 %v608_v33 }
 0x1f9   : > { %697 = vpow2.f32 %v609_v34 }
 0x1fe   : > { %v692_v35 = vpop.eup %691 }
 0x1ff   : > { %v694_v36 = vpop.eup %693  ;;  %v468_v37 = vadd.f32 1.0, %v692_v35 }
 0x200   : > { %v469_v38 = vadd.f32 1.0, %v694_v36 }
 0x201   : > { %699 = vrcp.f32 %v468_v37 }
 0x202   : > { %v696_v39 = vpop.eup %695  ;;  %701 = vrcp.f32 %v469_v38 }
 0x203   : > { %v698_v40 = vpop.eup %697  ;;  %v470_v41 = vadd.f32 1.0, %v696_v39 }
 0x204   : > { %v471_v42 = vadd.f32 1.0, %v698_v40 }
 0x205   : > { %703 = vrcp.f32 %v470_v41 }
 0x206   : > { %705 = vrcp.f32 %v471_v42 }
 0x20b   : > { %v700_v43 = vpop.eup %699 }
 0x20c   : > { %v702_v44 = vpop.eup %701  ;;  %v480_v45 = vmul.f32 %v700_v43, %v985_v4 }
 0x20d   : > { %v481_v46 = vmul.f32 %v702_v44, %v981_v2 }
 0x20e   : > { %484 = vst [vmem:[%s260_s14] sm:$0xff] %v480_v45 }
 0x20f   : > { %v704_v47 = vpop.eup %703  ;;  %485 = vst [vmem:[%s260_s14 + $0x8] sm:$0xff] %v481_v46 }
 0x210   : > { %v706_v48 = vpop.eup %705  ;;  %v482_v49 = vmul.f32 %v704_v47, %v989_v6 }
 0x211   : > { %v483_v50 = vmul.f32 %v706_v48, %v983_v3 }
 0x212   : > { %486 = vst [vmem:[%s260_s14 + $0x10] sm:$0xff] %v482_v49 }
 0x213   : > { %487 = vst [vmem:[%s260_s14 + $0x18] sm:$0xff] %v483_v50 }
 0x214   : > { %750 = shalt.err (!%p747_p5)
}
 0x215   : > { %s751_s15 = scalar_lea.hbm %s1020_s24, 512  ;;  %s755_s10 = scalar_lea.hbm %s1077_s5, 1024 }
 0x216   : > { %p752_p4 = scmp.ne.s32.totalorder %s1020_s24, %s751_s15  ;;  %p756_p12 = scmp.lt.u32.totalorder %s1020_s24, %s1077_s5 }
 0x217   : > { %p757_p1 = scmp.lt.u32.totalorder %s755_s10, %s751_s15  ;;  %p759_p8 = scmp.lt.u32.totalorder %s751_s15, %s1020_s24 }
 0x218   : > { %p753_p7 = pnand %p752_p4, %p1085_p9 }
 0x219   : > { %p758_p3 = por %p757_p1, %p756_p12 }
 0x21a   : > { %p754_p10 = pneg %p753_p7 }
 0x21b   : > { %p760_p11 = por %p759_p8, %p758_p3 }
 0x21d   : > { %p761_p0 = pnand %p760_p11, %p754_p10 }
 0x21f   : > { %764 = shalt.err (!%p761_p0)
}
 0x220   : > { %s827_s16 = smov 256   ;;  %s828_s17 = smov 16  }
 0x221   : > { %623 = dma.vmem_to_hbm [thread:$0]  (%p1085_p9), %s1022_s30, 512, %s1020_s24, %s489_s21, %s827_s16, %s827_s16, %s828_s17  }
 0x222 PF: > { %s519_s28 = sand.u32 1, %s799_s18   ;;  %p1086_p6 = scmp.ne.s32.totalorder %s1082_s8, 0 }
 0x223   : > { %p1087_p13 = scmp.ge.s32.totalorder %s819_s23, 2  ;;  %s520_s9 = scalar_lea.sflag [#allocation4], %s519_s28 }
 0x225   : > { %p630_p2 = pnand %p1087_p13, %p1086_p6 }
 0x227   : > { %794 = dma.done.wait (!%p630_p2), %s520_s9, 512  }
 0x228   : > { %796 = vsyncadd (!%p630_p2), %s520_s9, 4294966784  ;;  %s21_s23 = sadd.s32 1, %s819_s23   ;;  %s1088_s18 = smov %s803_s19 }
 0x229   : > { %p18_p5 = scmp.ge.s32.totalorder %s21_s23, 4   ;;  %s1089_s19 = smov %s807_s20 }
 0x22a   : > { %s1090_s20 = smov %s915_s7  ;;  %s1091_s21 = smov %s815_s22 }
 0x22b   : > { %s1092_s22 = smov %s1094_s26  ;;  %20 = sbr.rel (!%p18_p5) target bundleno = 6 (0x6), region = 85 }
 0x232   :  { %525 = vsyncpa [#allocation3], 1 }
 0x233   :  { %527 = vsyncpa [#allocation3 + $0x1], 1 }
 0x234   :  { %528 = vsyncpa [#allocation4], 1 }
 0x235   :  { %530 = vsyncpa [#allocation4 + $0x1], 1 }

</bundles_post_ra>
